<compile_context>
chip_gen: v7x
topology: tpu7x:2x2x1
jax: 0.10.0
libtpu: 0.0.40
codegen_flags: <defaults>
</compile_context>

<pallas_src>
import jax
import jax.numpy as jnp
from jax.experimental import pallas as pl
from jax.experimental.pallas import tpu as pltpu


def drqn_kernel(s_ref, w1_ref, b1_ref, wih_ref, whh_ref, blstm_ref,
                w3p_ref, b3p_ref, h0_ref, c0_ref,
                q_ref, hn_ref, cn_ref):
    """s_ref:   (T*B, D)  time-major flattened input.
    w1: (D, H), b1: (1, H)
    wih: (H, 4H), whh: (H, 4H), blstm: (1, 4H)     -- gate order i, f, g, o
    w3p: (H, O_pad), b3p: (1, O_pad)               -- zero-padded to 128 lanes
    h0, c0: (B, H)   (aliased with hn, cn outputs)
    Outputs: q (T*B, O_pad) lane-dense slab, hn (B, H), cn (B, H).
    """
    H = w1_ref.shape[1]
    B = h0_ref.shape[0]
    TB = s_ref.shape[0]
    T = TB // B

    # --- fc1 + input-to-hidden gate matmul, hoisted out of the recurrence ---
    # Both run at full (T*B)-row MXU efficiency; result (T*B, 4H) stays in
    # vregs (2 vregs at these shapes), no scratch round-trip.
    x1 = jnp.dot(s_ref[...], w1_ref[...],
                 preferred_element_type=jnp.float32) + b1_ref[...]
    gx = jnp.dot(x1, wih_ref[...],
                 preferred_element_type=jnp.float32) + blstm_ref[...]

    # TODO(synk): keep this RHS resident in the MXU with matmul_push_rhs /
    # matmul_acc_lhs / matmul_pop once verified on all target generations.
    whh = whh_ref[...]

    # Lane-constant vectors for the single-tanh activation trick:
    #   sigmoid(x) = 0.5 * tanh(0.5 * x) + 0.5  on the i/f/o lane groups,
    #   tanh(x)                                   on the g lane group.
    lane = jax.lax.broadcasted_iota(jnp.int32, (1, 4 * H), 1)
    is_g = jnp.logical_and(lane >= 2 * H, lane < 3 * H)
    scale = jnp.where(is_g, 1.0, 0.5).astype(jnp.float32)   # pre/post scale
    offset = jnp.where(is_g, 0.0, 0.5).astype(jnp.float32)  # post offset

    # --- LSTM recurrence over time (only h @ whh left inside the loop) ---
    # Static Python unroll: all 8 h_t stay live in vregs for the fused fc3.
    h = h0_ref[...]
    c = c0_ref[...]
    hs = []
    for t in range(T):
        row = t * B
        gates = gx[row:row + B, :] + jnp.dot(
            h, whh, preferred_element_type=jnp.float32)
        # One full-width (B, 4H=128) EUP tanh; sigmoid recovered on VALU.
        act = jnp.tanh(gates * scale) * scale + offset
        i = act[:, 0 * H:1 * H]
        f = act[:, 1 * H:2 * H]
        g = act[:, 2 * H:3 * H]
        o = act[:, 3 * H:4 * H]
        c = f * c + i * g
        h = o * jnp.tanh(c)
        hs.append(h)

    hn_ref[...] = h
    cn_ref[...] = c

    # --- ReLU + fc3 over all (T*B) rows at once, lane-dense (O_pad) output ---
    h_all = jnp.maximum(jnp.concatenate(hs, axis=0), 0.0)
    q_ref[...] = (jnp.dot(h_all, w3p_ref[...],
                          preferred_element_type=jnp.float32) + b3p_ref[...])


def drqn_forward(s, params, hidden=None):
    """s: (B, T, in_dim) float32, batch_first like the PyTorch module.
    Returns (q (B, T, out_dim), (h_n (B, H), c_n (B, H)))."""
    B, T, D = s.shape
    H = params["w1"].shape[1]
    O = params["w3"].shape[1]
    O_pad = params["w3p"].shape[1]
    if hidden is None:
        h0 = jnp.zeros((B, H), jnp.float32)
        c0 = jnp.zeros((B, H), jnp.float32)
    else:
        h0, c0 = hidden

    # Time-major flattened input (T*B, D): row t*B + b <-> (t, b).
    s_tm = jnp.transpose(s, (1, 0, 2)).reshape(T * B, D)

    vmem = pl.BlockSpec(memory_space=pltpu.MemorySpace.VMEM)
    out_shapes = (jax.ShapeDtypeStruct((T * B, O_pad), jnp.float32),
                  jax.ShapeDtypeStruct((B, H), jnp.float32),
                  jax.ShapeDtypeStruct((B, H), jnp.float32))

    q_slab, hn, cn = pl.pallas_call(
        drqn_kernel,
        out_shape=out_shapes,
        in_specs=[vmem] * 10,
        out_specs=(vmem, vmem, vmem),
        # Recurrent state buffers become the hn/cn outputs.
        input_output_aliases={8: 1, 9: 2},
    )(s_tm, params["w1"], params["b1"], params["wih"], params["whh"],
      params["b_lstm"], params["w3p"], params["b3p"], h0, c0)

    q = jnp.transpose(q_slab.reshape(T, B, O_pad)[:, :, :O], (1, 0, 2))
    return q, (hn, cn)


def make_params(key, in_dim, out_dim, unit_num):
    """Deterministic synthetic parameters mirroring the PyTorch module shapes.
    Stored pre-transposed for right-multiplication (x @ W). fc3 is also stored
    zero-padded to 128 lanes (w3p/b3p) once, so the kernel's q store is a
    full-lane unmasked vector store."""
    H = unit_num
    k = jax.random.split(key, 8)
    # fc1: kaiming_normal_ on weight (H, in_dim), fan_in = in_dim
    w1 = jax.random.normal(k[0], (in_dim, H), jnp.float32) * jnp.sqrt(2.0 / in_dim)
    b1 = (jax.random.uniform(k[1], (1, H), jnp.float32) - 0.5) * 0.1
    # LSTM: default PyTorch init U(-1/sqrt(H), 1/sqrt(H)), gate order i,f,g,o
    bound = 1.0 / jnp.sqrt(H)
    wih = jax.random.uniform(k[2], (H, 4 * H), jnp.float32, -bound, bound)
    whh = jax.random.uniform(k[3], (H, 4 * H), jnp.float32, -bound, bound)
    b_ih = jax.random.uniform(k[4], (1, 4 * H), jnp.float32, -bound, bound)
    b_hh = jax.random.uniform(k[5], (1, 4 * H), jnp.float32, -bound, bound)
    b_lstm = b_ih + b_hh
    # fc3: kaiming_normal_ on weight (out_dim, H), fan_in = H
    w3 = jax.random.normal(k[6], (H, out_dim), jnp.float32) * jnp.sqrt(2.0 / H)
    b3 = (jax.random.uniform(k[7], (1, out_dim), jnp.float32) - 0.5) * 0.1
    # Pad fc3 once (hoisted out of the per-call wrapper).
    O_pad = max(128, ((out_dim + 127) // 128) * 128)
    w3p = jnp.zeros((H, O_pad), jnp.float32).at[:, :out_dim].set(w3)
    b3p = jnp.zeros((1, O_pad), jnp.float32).at[:, :out_dim].set(b3)
    return dict(w1=w1, b1=b1, wih=wih, whh=whh, b_lstm=b_lstm,
                w3=w3, b3=b3, w3p=w3p, b3p=b3p)


def ref_forward(s, p, h0, c0):
    """Pure-JAX reference of the PyTorch forward (for correctness check)."""
    x = jnp.einsum("btd,dh->bth", s, p["w1"]) + p["b1"][0]
    B, T, H = x.shape
    h, c = h0, c0
    outs = []
    for t in range(T):
        gates = x[:, t] @ p["wih"] + h @ p["whh"] + p["b_lstm"][0]
        i = jax.nn.sigmoid(gates[:, :H])
        f = jax.nn.sigmoid(gates[:, H:2 * H])
        g = jnp.tanh(gates[:, 2 * H:3 * H])
        o = jax.nn.sigmoid(gates[:, 3 * H:])
        c = f * c + i * g
        h = o * jnp.tanh(c)
        outs.append(h)
    hs = jnp.stack(outs, axis=1)
    q = jnp.maximum(hs, 0.0) @ p["w3"] + p["b3"][0]
    return q, h, c


if __name__ == "__main__":
    # Small shapes implied by the module: s is (batch, seq, obs_dim),
    # Linear(in_dim -> unit_num), LSTM(unit_num), Linear(unit_num -> out_dim).
    B, T, IN_DIM, UNIT, OUT_DIM = 2, 8, 16, 32, 4

    key = jax.random.PRNGKey(0)
    pkey, skey = jax.random.split(key)
    params = make_params(pkey, IN_DIM, OUT_DIM, UNIT)
    s = jax.random.normal(skey, (B, T, IN_DIM), jnp.float32)

    fwd = jax.jit(drqn_forward)
    q, (hn, cn) = fwd(s, params)
    q = jax.block_until_ready(q)
    hn = jax.block_until_ready(hn)
    cn = jax.block_until_ready(cn)

    # Correctness vs pure-JAX reference of the PyTorch semantics.
    q_ref, h_ref, c_ref = ref_forward(
        s, params, jnp.zeros((B, UNIT), jnp.float32), jnp.zeros((B, UNIT), jnp.float32))
    assert q.shape == (B, T, OUT_DIM) and hn.shape == (B, UNIT) and cn.shape == (B, UNIT)
    assert jnp.allclose(q, q_ref, atol=1e-4, rtol=1e-4)
    assert jnp.allclose(hn, h_ref, atol=1e-4, rtol=1e-4)
    assert jnp.allclose(cn, c_ref, atol=1e-4, rtol=1e-4)

    print("KERNEL_OK")
</pallas_src>

<mosaic_0001>
module attributes {stable_mosaic.version = 11 : i64} {
  func.func @drqn_kernel(%arg0: memref<16x16xf32, #tpu.memory_space<vmem>>, %arg1: memref<16x32xf32, #tpu.memory_space<vmem>>, %arg2: memref<1x32xf32, #tpu.memory_space<vmem>>, %arg3: memref<32x128xf32, #tpu.memory_space<vmem>>, %arg4: memref<32x128xf32, #tpu.memory_space<vmem>>, %arg5: memref<1x128xf32, #tpu.memory_space<vmem>>, %arg6: memref<32x128xf32, #tpu.memory_space<vmem>>, %arg7: memref<1x128xf32, #tpu.memory_space<vmem>>, %arg8: memref<2x32xf32, #tpu.memory_space<vmem>>, %arg9: memref<2x32xf32, #tpu.memory_space<vmem>>, %arg10: memref<16x128xf32, #tpu.memory_space<vmem>>, %arg11: memref<2x32xf32, #tpu.memory_space<vmem>>, %arg12: memref<2x32xf32, #tpu.memory_space<vmem>>) attributes {dimension_semantics = [], scalar_prefetch = 0 : i64, scratch_operands = 0 : i64, tpu.core_type = #tpu.core_type<tc>} {
    %c0 = arith.constant 0 : index
    %c0_0 = arith.constant 0 : index
    %0 = vector.load %arg0[%c0, %c0_0] : memref<16x16xf32, #tpu.memory_space<vmem>>, vector<16x16xf32>
    %c0_1 = arith.constant 0 : index
    %c0_2 = arith.constant 0 : index
    %1 = vector.load %arg1[%c0_1, %c0_2] : memref<16x32xf32, #tpu.memory_space<vmem>>, vector<16x32xf32>
    %cst = arith.constant dense<0.000000e+00> : vector<16x32xf32>
    %2 = tpu.matmul %0, %1, %cst {dimension_numbers = #tpu.dot_dimension_numbers<[1], [0], [0], [1], [0, 0, 1, 1], [], []>} : vector<16x16xf32>, vector<16x32xf32>, vector<16x32xf32> -> vector<16x32xf32>
    %c0_3 = arith.constant 0 : index
    %c0_4 = arith.constant 0 : index
    %3 = vector.load %arg2[%c0_3, %c0_4] : memref<1x32xf32, #tpu.memory_space<vmem>>, vector<1x32xf32>
    %4 = vector.broadcast %3 : vector<1x32xf32> to vector<16x32xf32>
    %5 = arith.addf %2, %4 : vector<16x32xf32>
    %c0_5 = arith.constant 0 : index
    %c0_6 = arith.constant 0 : index
    %6 = vector.load %arg3[%c0_5, %c0_6] : memref<32x128xf32, #tpu.memory_space<vmem>>, vector<32x128xf32>
    %cst_7 = arith.constant dense<0.000000e+00> : vector<16x128xf32>
    %7 = tpu.matmul %5, %6, %cst_7 {dimension_numbers = #tpu.dot_dimension_numbers<[1], [0], [0], [1], [0, 0, 1, 1], [], []>} : vector<16x32xf32>, vector<32x128xf32>, vector<16x128xf32> -> vector<16x128xf32>
    %c0_8 = arith.constant 0 : index
    %c0_9 = arith.constant 0 : index
    %8 = vector.load %arg5[%c0_8, %c0_9] : memref<1x128xf32, #tpu.memory_space<vmem>>, vector<1x128xf32>
    %9 = vector.broadcast %8 : vector<1x128xf32> to vector<16x128xf32>
    %10 = arith.addf %7, %9 : vector<16x128xf32>
    %c0_10 = arith.constant 0 : index
    %c0_11 = arith.constant 0 : index
    %11 = vector.load %arg4[%c0_10, %c0_11] : memref<32x128xf32, #tpu.memory_space<vmem>>, vector<32x128xf32>
    %12 = tpu.iota {dimensions = array<i32: 1>} : vector<1x128xi32>
    %c64_i32 = arith.constant 64 : i32
    %13 = vector.broadcast %c64_i32 : i32 to vector<1x128xi32>
    %14 = arith.cmpi sge, %12, %13 : vector<1x128xi32>
    %c96_i32 = arith.constant 96 : i32
    %15 = vector.broadcast %c96_i32 : i32 to vector<1x128xi32>
    %16 = arith.cmpi slt, %12, %15 : vector<1x128xi32>
    %17 = arith.andi %14, %16 : vector<1x128xi1>
    %cst_12 = arith.constant 1.000000e+00 : f32
    %cst_13 = arith.constant 5.000000e-01 : f32
    %18 = vector.broadcast %cst_12 : f32 to vector<1x128xf32>
    %19 = vector.broadcast %cst_13 : f32 to vector<1x128xf32>
    %20 = arith.select %17, %18, %19 : vector<1x128xi1>, vector<1x128xf32>
    %cst_14 = arith.constant 0.000000e+00 : f32
    %cst_15 = arith.constant 5.000000e-01 : f32
    %21 = vector.broadcast %cst_14 : f32 to vector<1x128xf32>
    %22 = vector.broadcast %cst_15 : f32 to vector<1x128xf32>
    %23 = arith.select %17, %21, %22 : vector<1x128xi1>, vector<1x128xf32>
    %c0_16 = arith.constant 0 : index
    %c0_17 = arith.constant 0 : index
    %24 = vector.load %arg8[%c0_16, %c0_17] : memref<2x32xf32, #tpu.memory_space<vmem>>, vector<2x32xf32>
    %c0_18 = arith.constant 0 : index
    %c0_19 = arith.constant 0 : index
    %25 = vector.load %arg9[%c0_18, %c0_19] : memref<2x32xf32, #tpu.memory_space<vmem>>, vector<2x32xf32>
    %26 = vector.extract_strided_slice %10 {offsets = [0, 0], sizes = [2, 128], strides = [1, 1]} : vector<16x128xf32> to vector<2x128xf32>
    %cst_20 = arith.constant dense<0.000000e+00> : vector<2x128xf32>
    %27 = tpu.matmul %24, %11, %cst_20 {dimension_numbers = #tpu.dot_dimension_numbers<[1], [0], [0], [1], [0, 0, 1, 1], [], []>} : vector<2x32xf32>, vector<32x128xf32>, vector<2x128xf32> -> vector<2x128xf32>
    %28 = arith.addf %26, %27 : vector<2x128xf32>
    %29 = vector.broadcast %20 : vector<1x128xf32> to vector<2x128xf32>
    %30 = arith.mulf %28, %29 : vector<2x128xf32>
    %31 = math.tanh %30 : vector<2x128xf32>
    %32 = vector.broadcast %20 : vector<1x128xf32> to vector<2x128xf32>
    %33 = arith.mulf %31, %32 : vector<2x128xf32>
    %34 = vector.broadcast %23 : vector<1x128xf32> to vector<2x128xf32>
    %35 = arith.addf %33, %34 : vector<2x128xf32>
    %36 = vector.extract_strided_slice %35 {offsets = [0, 0], sizes = [2, 32], strides = [1, 1]} : vector<2x128xf32> to vector<2x32xf32>
    %37 = vector.extract_strided_slice %35 {offsets = [0, 32], sizes = [2, 32], strides = [1, 1]} : vector<2x128xf32> to vector<2x32xf32>
    %38 = vector.extract_strided_slice %35 {offsets = [0, 64], sizes = [2, 32], strides = [1, 1]} : vector<2x128xf32> to vector<2x32xf32>
    %39 = vector.extract_strided_slice %35 {offsets = [0, 96], sizes = [2, 32], strides = [1, 1]} : vector<2x128xf32> to vector<2x32xf32>
    %40 = arith.mulf %37, %25 : vector<2x32xf32>
    %41 = arith.mulf %36, %38 : vector<2x32xf32>
    %42 = arith.addf %40, %41 : vector<2x32xf32>
    %43 = math.tanh %42 : vector<2x32xf32>
    %44 = arith.mulf %39, %43 : vector<2x32xf32>
    %45 = vector.extract_strided_slice %10 {offsets = [2, 0], sizes = [2, 128], strides = [1, 1]} : vector<16x128xf32> to vector<2x128xf32>
    %cst_21 = arith.constant dense<0.000000e+00> : vector<2x128xf32>
    %46 = tpu.matmul %44, %11, %cst_21 {dimension_numbers = #tpu.dot_dimension_numbers<[1], [0], [0], [1], [0, 0, 1, 1], [], []>} : vector<2x32xf32>, vector<32x128xf32>, vector<2x128xf32> -> vector<2x128xf32>
    %47 = arith.addf %45, %46 : vector<2x128xf32>
    %48 = vector.broadcast %20 : vector<1x128xf32> to vector<2x128xf32>
    %49 = arith.mulf %47, %48 : vector<2x128xf32>
    %50 = math.tanh %49 : vector<2x128xf32>
    %51 = vector.broadcast %20 : vector<1x128xf32> to vector<2x128xf32>
    %52 = arith.mulf %50, %51 : vector<2x128xf32>
    %53 = vector.broadcast %23 : vector<1x128xf32> to vector<2x128xf32>
    %54 = arith.addf %52, %53 : vector<2x128xf32>
    %55 = vector.extract_strided_slice %54 {offsets = [0, 0], sizes = [2, 32], strides = [1, 1]} : vector<2x128xf32> to vector<2x32xf32>
    %56 = vector.extract_strided_slice %54 {offsets = [0, 32], sizes = [2, 32], strides = [1, 1]} : vector<2x128xf32> to vector<2x32xf32>
    %57 = vector.extract_strided_slice %54 {offsets = [0, 64], sizes = [2, 32], strides = [1, 1]} : vector<2x128xf32> to vector<2x32xf32>
    %58 = vector.extract_strided_slice %54 {offsets = [0, 96], sizes = [2, 32], strides = [1, 1]} : vector<2x128xf32> to vector<2x32xf32>
    %59 = arith.mulf %56, %42 : vector<2x32xf32>
    %60 = arith.mulf %55, %57 : vector<2x32xf32>
    %61 = arith.addf %59, %60 : vector<2x32xf32>
    %62 = math.tanh %61 : vector<2x32xf32>
    %63 = arith.mulf %58, %62 : vector<2x32xf32>
    %64 = vector.extract_strided_slice %10 {offsets = [4, 0], sizes = [2, 128], strides = [1, 1]} : vector<16x128xf32> to vector<2x128xf32>
    %cst_22 = arith.constant dense<0.000000e+00> : vector<2x128xf32>
    %65 = tpu.matmul %63, %11, %cst_22 {dimension_numbers = #tpu.dot_dimension_numbers<[1], [0], [0], [1], [0, 0, 1, 1], [], []>} : vector<2x32xf32>, vector<32x128xf32>, vector<2x128xf32> -> vector<2x128xf32>
    %66 = arith.addf %64, %65 : vector<2x128xf32>
    %67 = vector.broadcast %20 : vector<1x128xf32> to vector<2x128xf32>
    %68 = arith.mulf %66, %67 : vector<2x128xf32>
    %69 = math.tanh %68 : vector<2x128xf32>
    %70 = vector.broadcast %20 : vector<1x128xf32> to vector<2x128xf32>
    %71 = arith.mulf %69, %70 : vector<2x128xf32>
    %72 = vector.broadcast %23 : vector<1x128xf32> to vector<2x128xf32>
    %73 = arith.addf %71, %72 : vector<2x128xf32>
    %74 = vector.extract_strided_slice %73 {offsets = [0, 0], sizes = [2, 32], strides = [1, 1]} : vector<2x128xf32> to vector<2x32xf32>
    %75 = vector.extract_strided_slice %73 {offsets = [0, 32], sizes = [2, 32], strides = [1, 1]} : vector<2x128xf32> to vector<2x32xf32>
    %76 = vector.extract_strided_slice %73 {offsets = [0, 64], sizes = [2, 32], strides = [1, 1]} : vector<2x128xf32> to vector<2x32xf32>
    %77 = vector.extract_strided_slice %73 {offsets = [0, 96], sizes = [2, 32], strides = [1, 1]} : vector<2x128xf32> to vector<2x32xf32>
    %78 = arith.mulf %75, %61 : vector<2x32xf32>
    %79 = arith.mulf %74, %76 : vector<2x32xf32>
    %80 = arith.addf %78, %79 : vector<2x32xf32>
    %81 = math.tanh %80 : vector<2x32xf32>
    %82 = arith.mulf %77, %81 : vector<2x32xf32>
    %83 = vector.extract_strided_slice %10 {offsets = [6, 0], sizes = [2, 128], strides = [1, 1]} : vector<16x128xf32> to vector<2x128xf32>
    %cst_23 = arith.constant dense<0.000000e+00> : vector<2x128xf32>
    %84 = tpu.matmul %82, %11, %cst_23 {dimension_numbers = #tpu.dot_dimension_numbers<[1], [0], [0], [1], [0, 0, 1, 1], [], []>} : vector<2x32xf32>, vector<32x128xf32>, vector<2x128xf32> -> vector<2x128xf32>
    %85 = arith.addf %83, %84 : vector<2x128xf32>
    %86 = vector.broadcast %20 : vector<1x128xf32> to vector<2x128xf32>
    %87 = arith.mulf %85, %86 : vector<2x128xf32>
    %88 = math.tanh %87 : vector<2x128xf32>
    %89 = vector.broadcast %20 : vector<1x128xf32> to vector<2x128xf32>
    %90 = arith.mulf %88, %89 : vector<2x128xf32>
    %91 = vector.broadcast %23 : vector<1x128xf32> to vector<2x128xf32>
    %92 = arith.addf %90, %91 : vector<2x128xf32>
    %93 = vector.extract_strided_slice %92 {offsets = [0, 0], sizes = [2, 32], strides = [1, 1]} : vector<2x128xf32> to vector<2x32xf32>
    %94 = vector.extract_strided_slice %92 {offsets = [0, 32], sizes = [2, 32], strides = [1, 1]} : vector<2x128xf32> to vector<2x32xf32>
    %95 = vector.extract_strided_slice %92 {offsets = [0, 64], sizes = [2, 32], strides = [1, 1]} : vector<2x128xf32> to vector<2x32xf32>
    %96 = vector.extract_strided_slice %92 {offsets = [0, 96], sizes = [2, 32], strides = [1, 1]} : vector<2x128xf32> to vector<2x32xf32>
    %97 = arith.mulf %94, %80 : vector<2x32xf32>
    %98 = arith.mulf %93, %95 : vector<2x32xf32>
    %99 = arith.addf %97, %98 : vector<2x32xf32>
    %100 = math.tanh %99 : vector<2x32xf32>
    %101 = arith.mulf %96, %100 : vector<2x32xf32>
    %102 = vector.extract_strided_slice %10 {offsets = [8, 0], sizes = [2, 128], strides = [1, 1]} : vector<16x128xf32> to vector<2x128xf32>
    %cst_24 = arith.constant dense<0.000000e+00> : vector<2x128xf32>
    %103 = tpu.matmul %101, %11, %cst_24 {dimension_numbers = #tpu.dot_dimension_numbers<[1], [0], [0], [1], [0, 0, 1, 1], [], []>} : vector<2x32xf32>, vector<32x128xf32>, vector<2x128xf32> -> vector<2x128xf32>
    %104 = arith.addf %102, %103 : vector<2x128xf32>
    %105 = vector.broadcast %20 : vector<1x128xf32> to vector<2x128xf32>
    %106 = arith.mulf %104, %105 : vector<2x128xf32>
    %107 = math.tanh %106 : vector<2x128xf32>
    %108 = vector.broadcast %20 : vector<1x128xf32> to vector<2x128xf32>
    %109 = arith.mulf %107, %108 : vector<2x128xf32>
    %110 = vector.broadcast %23 : vector<1x128xf32> to vector<2x128xf32>
    %111 = arith.addf %109, %110 : vector<2x128xf32>
    %112 = vector.extract_strided_slice %111 {offsets = [0, 0], sizes = [2, 32], strides = [1, 1]} : vector<2x128xf32> to vector<2x32xf32>
    %113 = vector.extract_strided_slice %111 {offsets = [0, 32], sizes = [2, 32], strides = [1, 1]} : vector<2x128xf32> to vector<2x32xf32>
    %114 = vector.extract_strided_slice %111 {offsets = [0, 64], sizes = [2, 32], strides = [1, 1]} : vector<2x128xf32> to vector<2x32xf32>
    %115 = vector.extract_strided_slice %111 {offsets = [0, 96], sizes = [2, 32], strides = [1, 1]} : vector<2x128xf32> to vector<2x32xf32>
    %116 = arith.mulf %113, %99 : vector<2x32xf32>
    %117 = arith.mulf %112, %114 : vector<2x32xf32>
    %118 = arith.addf %116, %117 : vector<2x32xf32>
    %119 = math.tanh %118 : vector<2x32xf32>
    %120 = arith.mulf %115, %119 : vector<2x32xf32>
    %121 = vector.extract_strided_slice %10 {offsets = [10, 0], sizes = [2, 128], strides = [1, 1]} : vector<16x128xf32> to vector<2x128xf32>
    %cst_25 = arith.constant dense<0.000000e+00> : vector<2x128xf32>
    %122 = tpu.matmul %120, %11, %cst_25 {dimension_numbers = #tpu.dot_dimension_numbers<[1], [0], [0], [1], [0, 0, 1, 1], [], []>} : vector<2x32xf32>, vector<32x128xf32>, vector<2x128xf32> -> vector<2x128xf32>
    %123 = arith.addf %121, %122 : vector<2x128xf32>
    %124 = vector.broadcast %20 : vector<1x128xf32> to vector<2x128xf32>
    %125 = arith.mulf %123, %124 : vector<2x128xf32>
    %126 = math.tanh %125 : vector<2x128xf32>
    %127 = vector.broadcast %20 : vector<1x128xf32> to vector<2x128xf32>
    %128 = arith.mulf %126, %127 : vector<2x128xf32>
    %129 = vector.broadcast %23 : vector<1x128xf32> to vector<2x128xf32>
    %130 = arith.addf %128, %129 : vector<2x128xf32>
    %131 = vector.extract_strided_slice %130 {offsets = [0, 0], sizes = [2, 32], strides = [1, 1]} : vector<2x128xf32> to vector<2x32xf32>
    %132 = vector.extract_strided_slice %130 {offsets = [0, 32], sizes = [2, 32], strides = [1, 1]} : vector<2x128xf32> to vector<2x32xf32>
    %133 = vector.extract_strided_slice %130 {offsets = [0, 64], sizes = [2, 32], strides = [1, 1]} : vector<2x128xf32> to vector<2x32xf32>
    %134 = vector.extract_strided_slice %130 {offsets = [0, 96], sizes = [2, 32], strides = [1, 1]} : vector<2x128xf32> to vector<2x32xf32>
    %135 = arith.mulf %132, %118 : vector<2x32xf32>
    %136 = arith.mulf %131, %133 : vector<2x32xf32>
    %137 = arith.addf %135, %136 : vector<2x32xf32>
    %138 = math.tanh %137 : vector<2x32xf32>
    %139 = arith.mulf %134, %138 : vector<2x32xf32>
    %140 = vector.extract_strided_slice %10 {offsets = [12, 0], sizes = [2, 128], strides = [1, 1]} : vector<16x128xf32> to vector<2x128xf32>
    %cst_26 = arith.constant dense<0.000000e+00> : vector<2x128xf32>
    %141 = tpu.matmul %139, %11, %cst_26 {dimension_numbers = #tpu.dot_dimension_numbers<[1], [0], [0], [1], [0, 0, 1, 1], [], []>} : vector<2x32xf32>, vector<32x128xf32>, vector<2x128xf32> -> vector<2x128xf32>
    %142 = arith.addf %140, %141 : vector<2x128xf32>
    %143 = vector.broadcast %20 : vector<1x128xf32> to vector<2x128xf32>
    %144 = arith.mulf %142, %143 : vector<2x128xf32>
    %145 = math.tanh %144 : vector<2x128xf32>
    %146 = vector.broadcast %20 : vector<1x128xf32> to vector<2x128xf32>
    %147 = arith.mulf %145, %146 : vector<2x128xf32>
    %148 = vector.broadcast %23 : vector<1x128xf32> to vector<2x128xf32>
    %149 = arith.addf %147, %148 : vector<2x128xf32>
    %150 = vector.extract_strided_slice %149 {offsets = [0, 0], sizes = [2, 32], strides = [1, 1]} : vector<2x128xf32> to vector<2x32xf32>
    %151 = vector.extract_strided_slice %149 {offsets = [0, 32], sizes = [2, 32], strides = [1, 1]} : vector<2x128xf32> to vector<2x32xf32>
    %152 = vector.extract_strided_slice %149 {offsets = [0, 64], sizes = [2, 32], strides = [1, 1]} : vector<2x128xf32> to vector<2x32xf32>
    %153 = vector.extract_strided_slice %149 {offsets = [0, 96], sizes = [2, 32], strides = [1, 1]} : vector<2x128xf32> to vector<2x32xf32>
    %154 = arith.mulf %151, %137 : vector<2x32xf32>
    %155 = arith.mulf %150, %152 : vector<2x32xf32>
    %156 = arith.addf %154, %155 : vector<2x32xf32>
    %157 = math.tanh %156 : vector<2x32xf32>
    %158 = arith.mulf %153, %157 : vector<2x32xf32>
    %159 = vector.extract_strided_slice %10 {offsets = [14, 0], sizes = [2, 128], strides = [1, 1]} : vector<16x128xf32> to vector<2x128xf32>
    %cst_27 = arith.constant dense<0.000000e+00> : vector<2x128xf32>
    %160 = tpu.matmul %158, %11, %cst_27 {dimension_numbers = #tpu.dot_dimension_numbers<[1], [0], [0], [1], [0, 0, 1, 1], [], []>} : vector<2x32xf32>, vector<32x128xf32>, vector<2x128xf32> -> vector<2x128xf32>
    %161 = arith.addf %159, %160 : vector<2x128xf32>
    %162 = vector.broadcast %20 : vector<1x128xf32> to vector<2x128xf32>
    %163 = arith.mulf %161, %162 : vector<2x128xf32>
    %164 = math.tanh %163 : vector<2x128xf32>
    %165 = vector.broadcast %20 : vector<1x128xf32> to vector<2x128xf32>
    %166 = arith.mulf %164, %165 : vector<2x128xf32>
    %167 = vector.broadcast %23 : vector<1x128xf32> to vector<2x128xf32>
    %168 = arith.addf %166, %167 : vector<2x128xf32>
    %169 = vector.extract_strided_slice %168 {offsets = [0, 0], sizes = [2, 32], strides = [1, 1]} : vector<2x128xf32> to vector<2x32xf32>
    %170 = vector.extract_strided_slice %168 {offsets = [0, 32], sizes = [2, 32], strides = [1, 1]} : vector<2x128xf32> to vector<2x32xf32>
    %171 = vector.extract_strided_slice %168 {offsets = [0, 64], sizes = [2, 32], strides = [1, 1]} : vector<2x128xf32> to vector<2x32xf32>
    %172 = vector.extract_strided_slice %168 {offsets = [0, 96], sizes = [2, 32], strides = [1, 1]} : vector<2x128xf32> to vector<2x32xf32>
    %173 = arith.mulf %170, %156 : vector<2x32xf32>
    %174 = arith.mulf %169, %171 : vector<2x32xf32>
    %175 = arith.addf %173, %174 : vector<2x32xf32>
    %176 = math.tanh %175 : vector<2x32xf32>
    %177 = arith.mulf %172, %176 : vector<2x32xf32>
    %c0_28 = arith.constant 0 : index
    %c0_29 = arith.constant 0 : index
    %178 = vector.load %arg11[%c0_28, %c0_29] : memref<2x32xf32, #tpu.memory_space<vmem>>, vector<2x32xf32>
    tpu.vector_store %arg11[%c0_28, %c0_29], %177 {strides = array<i32>} : memref<2x32xf32, #tpu.memory_space<vmem>>, vector<2x32xf32>,
    %c0_30 = arith.constant 0 : index
    %c0_31 = arith.constant 0 : index
    %179 = vector.load %arg12[%c0_30, %c0_31] : memref<2x32xf32, #tpu.memory_space<vmem>>, vector<2x32xf32>
    tpu.vector_store %arg12[%c0_30, %c0_31], %175 {strides = array<i32>} : memref<2x32xf32, #tpu.memory_space<vmem>>, vector<2x32xf32>,
    %180 = tpu.concatenate %44, %63, %82, %101, %120, %139, %158, %177 in 0 : vector<2x32xf32>, vector<2x32xf32>, vector<2x32xf32>, vector<2x32xf32>, vector<2x32xf32>, vector<2x32xf32>, vector<2x32xf32>, vector<2x32xf32> -> vector<16x32xf32>
    %cst_32 = arith.constant 0.000000e+00 : f32
    %181 = vector.broadcast %cst_32 : f32 to vector<16x32xf32>
    %182 = arith.maximumf %180, %181 : vector<16x32xf32>
    %c0_33 = arith.constant 0 : index
    %c0_34 = arith.constant 0 : index
    %183 = vector.load %arg6[%c0_33, %c0_34] : memref<32x128xf32, #tpu.memory_space<vmem>>, vector<32x128xf32>
    %cst_35 = arith.constant dense<0.000000e+00> : vector<16x128xf32>
    %184 = tpu.matmul %182, %183, %cst_35 {dimension_numbers = #tpu.dot_dimension_numbers<[1], [0], [0], [1], [0, 0, 1, 1], [], []>} : vector<16x32xf32>, vector<32x128xf32>, vector<16x128xf32> -> vector<16x128xf32>
    %c0_36 = arith.constant 0 : index
    %c0_37 = arith.constant 0 : index
    %185 = vector.load %arg7[%c0_36, %c0_37] : memref<1x128xf32, #tpu.memory_space<vmem>>, vector<1x128xf32>
    %186 = vector.broadcast %185 : vector<1x128xf32> to vector<16x128xf32>
    %187 = arith.addf %184, %186 : vector<16x128xf32>
    %c0_38 = arith.constant 0 : index
    %c0_39 = arith.constant 0 : index
    %188 = vector.load %arg10[%c0_38, %c0_39] : memref<16x128xf32, #tpu.memory_space<vmem>>, vector<16x128xf32>
    tpu.vector_store %arg10[%c0_38, %c0_39], %187 {strides = array<i32>} : memref<16x128xf32, #tpu.memory_space<vmem>>, vector<16x128xf32>,
    return
  }
}

</mosaic_0001>

<bundles_post_ra>
// kernel: drqn_forward.1
= control target key start
LH: loop header
LB: loop body
LE: loop exit
PB: predicated region body
PF: predicated region fallthrough
CT: control target
= control target key end

     0   :  { %18 = vsyncpa [#allocation3], 0  ;;  %s1932_s0 = inlined_call_operand.vmem [shape: f32[16,16], index: 0, kind: input, shape index: {}]   ;;  %s1933_s1 = inlined_call_operand.hbm [shape: f32[16,32], index: 1, kind: input, shape index: {}]   ;;  %s1934_s2 = inlined_call_operand.vmem [shape: f32[1,32], index: 2, kind: input, shape index: {}]   ;;  %s1935_s3 = inlined_call_operand.vmem [shape: f32[32,128], index: 3, kind: input, shape index: {}]   ;;  %s1936_s4 = inlined_call_operand.vmem [shape: f32[32,128], index: 4, kind: input, shape index: {}]   ;;  %s1937_s5 = inlined_call_operand.vmem [shape: f32[1,128], index: 5, kind: input, shape index: {}]   ;;  %s1938_s6 = inlined_call_operand.hbm [shape: f32[32,128], index: 6, kind: input, shape index: {}]   ;;  %s1939_s7 = inlined_call_operand.hbm [shape: f32[1,128], index: 7, kind: input, shape index: {}]   ;;  %s1940_s8 = inlined_call_operand.vmem [shape: f32[2,32], index: 8, kind: input, shape index: {}, may-alias: {8,11}]   ;;  %s1941_s9 = inlined_call_operand.vmem [shape: f32[2,32], index: 9, kind: input, shape index: {}, may-alias: {9,12}]   ;;  %s1942_s10 = inlined_call_operand.vmem [shape: f32[16,128], index: 10, kind: output, shape index: {0}]   ;;  %s1943_s11 = inlined_call_operand.vmem [shape: f32[2,32], index: 11, kind: output, shape index: {1}, may-alias: {8,11}]   ;;  %s1944_s12 = inlined_call_operand.vmem [shape: f32[2,32], index: 12, kind: output, shape index: {2}, may-alias: {9,12}]  }
   0x1   :  { %19 = vsyncpa [#allocation5], 0  ;;  %s1604_s21 = smov [#allocation4]   ;;  %s1605_s23 = smov [#allocation2]  }
   0x2   :  { %s47_s22 = sshll.u32 %s1604_s21, 4  ;;  %s27_s24 = sshll.u32 %s1605_s23, 4  ;;  %s48_s22 = int_to_ptr.vmem [resolvable:$true] %s47_s22  ;;  %s1681_s24 = int_to_ptr.vmem [resolvable:$true] %s27_s24 }
   0x3   :  { %s1534_s27 = scalar_lea.hbm %s1938_s6, 512 }
   0x4   :  { %p1535_p0 = scmp.ne.s32.totalorder %s1938_s6, %s1534_s27  ;;  %p1538_p1 = scmp.lt.u32.totalorder %s1534_s27, %s1938_s6 }
   0x6   :  { %p1540_p2 = pnand %p1538_p1, %p1535_p0 }
   0x8   :  { %1543 = shalt.err (!%p1540_p2)
}
   0x9   :  { %s1544_s14 = scalar_lea.vmem %s48_s22, 512  ;;  %p1549_p4 = scmp.lt.s32.totalorder %s48_s22, %s48_s22 }
   0xa   :  { %p1545_p3 = scmp.ne.s32.totalorder %s48_s22, %s1544_s14  ;;  %p1550_p5 = scmp.lt.s32.totalorder %s1544_s14, %s1544_s14 }
   0xc   :  { %p1551_p6 = por %p1550_p5, %p1549_p4 }
   0xe   :  { %p1552_p7 = pnand %p1551_p6, %p1545_p3 }
  0x10   :  { %1555 = shalt.err (!%p1552_p7)
}
  0x11   :  { %s1606_s15 = smov 128   ;;  %s1607_s16 = smov 8  }
  0x12   :  { %53 = dma.hbm_to_vmem [thread:$0]  %s1938_s6, 512, %s48_s22, [#allocation5], %s1606_s15, %s1606_s15, %s1607_s16  }
  0x13   :  { %s1556_s21 = scalar_lea.hbm %s1933_s1, 256 }
  0x14   :  { %p1557_p8 = scmp.ne.s32.totalorder %s1933_s1, %s1556_s21  ;;  %p1560_p9 = scmp.lt.u32.totalorder %s1556_s21, %s1933_s1 }
  0x16   :  { %p1562_p10 = pnand %p1560_p9, %p1557_p8 }
  0x18   :  { %1565 = shalt.err (!%p1562_p10)
}
  0x19   :  { %s1566_s28 = scalar_lea.vmem %s1681_s24, 256  ;;  %p1571_p12 = scmp.lt.s32.totalorder %s1681_s24, %s1681_s24 }
  0x1a   :  { %p1567_p11 = scmp.ne.s32.totalorder %s1681_s24, %s1566_s28  ;;  %p1572_p13 = scmp.lt.s32.totalorder %s1566_s28, %s1566_s28 }
  0x1c   :  { %p1573_p0 = por %p1572_p13, %p1571_p12 }
  0x1e   :  { %p1574_p1 = pnand %p1573_p0, %p1567_p11 }
  0x20   :  { %1577 = shalt.err (!%p1574_p1)
}
  0x21   :  { %33 = dma.hbm_to_vmem [thread:$0]  %s1933_s1, 256, %s1681_s24, [#allocation3], %s1606_s15, %s1606_s15, %s1607_s16  }
  0x22   :  { %s1608_s29 = smov [#allocation6]   ;;  %s1578_s17 = scalar_lea.hbm %s1939_s7, 16 }
  0x23   :  { %s60_s30 = sshll.u32 %s1608_s29, 4  ;;  %p1579_p2 = scmp.ne.s32.totalorder %s1939_s7, %s1578_s17  ;;  %s61_s30 = int_to_ptr.vmem [resolvable:$true] %s60_s30 }
  0x24   :  { %p1582_p3 = scmp.lt.u32.totalorder %s1578_s17, %s1939_s7 }
  0x26   :  { %p1584_p4 = pnand %p1582_p3, %p1579_p2 }
  0x28   :  { %1587 = shalt.err (!%p1584_p4)
}
  0x29   :  { %s1588_s23 = scalar_lea.vmem %s61_s30, 16  ;;  %s1592_s1 = scalar_lea.vmem %s61_s30, 32 }
  0x2a   :  { %p1589_p5 = scmp.ne.s32.totalorder %s61_s30, %s1588_s23  ;;  %p1593_p6 = scmp.lt.s32.totalorder %s61_s30, %s61_s30 }
  0x2b   :  { %p1594_p7 = scmp.lt.s32.totalorder %s1592_s1, %s1588_s23 }
  0x2d   :  { %p1595_p8 = por %p1594_p7, %p1593_p6 }
  0x2f   :  { %p1596_p9 = pnand %p1595_p8, %p1589_p5 }
  0x31   :  { %1599 = shalt.err (!%p1596_p9)
}
  0x32   :  { %63 = dma.hbm_to_vmem [thread:$0]  %s1939_s7, 16, %s61_s30, [#allocation5]  }
  0x33   :  { %1600 = dma.done.wait [#allocation3], 256  }
  0x34   :  { %1601 = vsyncadd [#allocation3], 4294967040 }
  0x35   :  { %1602 = dma.done.wait [#allocation5], 528  }
  0x36   :  { %1603 = vsyncadd [#allocation5], 4294966768  ;;  %vm88_vm0 = vcmask 130048   ;;  %v79_v0 = vld [vmem:[#allocation2] sm:$0xff]  ;;  %v80_v1 = vld [vmem:[#allocation2 + $0x8] sm:$0xff]  ;;  %v1609_v8 = vmov 0.0|0.0   ;;  %v267_v27 = vlaneseq }
  0x37   :  { %v77_v2 = vld [vmem:[%s1932_s0] sm:$0xff]  ;;  %v1422_v3 = vpack.c.bf16 %v80_v1, %v79_v0  ;;  %v171_v5 = vld [vmem:[%s1935_s3 + $0x8] sm:$0xff]  ;;  %v172_v12 = vld [vmem:[%s1935_s3 + $0x10] sm:$0xff]  ;;  %vm181_vm1 = vcmask 261120   ;;  %vm1610_vm2 = vmmov 0   ;;  %v1611_v19 = vmov 0.0  }
  0x38   :  { %1309 = vmatprep.mubr.msk.f32.mxu0 %vm88_vm0, %v77_v2  ;;  %v170_v4 = vld [vmem:[%s1935_s3] sm:$0xff]  ;;  %v78_v7 = vld [vmem:[%s1932_s0 + $0x8] sm:$0xff]  ;;  %v173_v13 = vld [vmem:[%s1935_s3 + $0x18] sm:$0xff]  ;;  %v268_v28 = vand.u32 127, %v267_v27  ;;  %v1612_v34 = vmov 0.5   ;;  %s1614_s26 = smov 32  }
  0x39   :  { %v1426_v6 = vpack.c.bf16 %v171_v5, %v170_v4  ;;  %1423 = vmatprep.subr.bf16.mxu0 %v1422_v3  ;;  %v263_v9 = vld [vmem:[%s1936_s4] sm:$0xff]  ;;  %v264_v10 = vld [vmem:[%s1936_s4 + $0x8] sm:$0xff]  ;;  %v1430_v14 = vpack.c.bf16 %v173_v13, %v172_v12  ;;  %v265_v15 = vld [vmem:[%s1936_s4 + $0x10] sm:$0xff]  ;;  %vm1109_vm6 = vcmask 1041408   ;;  %vm1111_vm7 = vcmask 1043456  }
  0x3a   :  { %1425 = vmatpush3.bf16.msra.mxu0 %v1422_v3  ;;  %v1745_v11 = vpack.c.bf16 %v264_v10, %v263_v9  ;;  %v266_v16 = vld [vmem:[%s1936_s4 + $0x18] sm:$0xff]  ;;  %v274_v18 = vld [vmem:[%s1940_s8] sm:$0x3]  ;;  %vm269_vm3 = vcmp.ge.s32.totalorder %v268_v28, 64  ;;  %vm270_vm4 = vcmp.lt.s32.totalorder %v268_v28, 96  ;;  %vm1113_vm8 = vcmask 1045504  }
  0x3b   :  { %1427 = vmatprep.subr.bf16.mxu1 %v1426_v6  ;;  %1434 = vmatprep.subr.bf16.mxu0 %v1609_v8  ;;  %v1761_v17 = vpack.c.bf16 %v266_v16, %v265_v15  ;;  %v1232_v20 = vld [vmem:[%s1934_s2] ss:$0 sm:$0xff]  ;;  %vm271_vm5 = vmand %vm269_vm3, %vm270_vm4  ;;  %vm1102_vm9 = vcmask 261126  }
  0x3c   :  { %1429 = vmatpush3.bf16.msra.mxu1 %v1426_v6  ;;  %v1235_v29 = vld [vmem:[%s1937_s5] ss:$0 sm:$0xff]  ;;  %v1796_v35 = vsel %vm271_vm5, 1.0, %v1612_v34  ;;  %v1800_v39 = vsel %vm271_vm5, 0.0, %v1612_v34  ;;  %s1613_s5 = smov 64  }
  0x3d   :  { %1310 = vmatmul.mubr.msk.f32.vlgmr.msra.gmra.mrb[0].mxu0 %vm88_vm0, %v78_v7  ;;  %1431 = vmatprep.subr.bf16.mxu1 %v1430_v14  ;;  %v275_v42 = vld [vmem:[%s1941_s9] sm:$0x3]  ;;  %s1615_s9 = smov 96  }
  0x3e   :  { %1436 = vmatpush3.bf16.msra.mxu0 %v1745_v11  ;;  %1331 = vmatprep.mubr.msk.f32.mxu0 %vm1610_vm2, %v1611_v19 }
  0x3f   :  { %1437 = vmatprep.subr.bf16.mxu0 %v1609_v8 }
  0x40   :  { %1433 = vmatpush3.bf16.msra.mxu1 %v1430_v14 }
  0x41   :  { %1440 = vmatprep.subr.bf16.mxu1 %v1609_v8 }
  0x42   :  { %1439 = vmatpush3.bf16.msra.mxu0 %v1761_v17 }
  0x43   :  { %1446 = vmatprep.subr.bf16.mxu0 %v1609_v8 }
  0x45   :  { %1332 = vmatmul.mubr.msk.f32.vlgmr.msra.gmra.mrb[2].mxu0 %vm181_vm1, %v274_v18 }
  0x46   :  { %1448 = vmatpush3.bf16.msra.mxu0 %v1745_v11  ;;  %1353 = vmatprep.mubr.msk.f32.mxu0 %vm1610_vm2, %v1611_v19 }
  0x47   :  { %1449 = vmatprep.subr.bf16.mxu0 %v1609_v8 }
  0x4a   :  { %1451 = vmatpush3.bf16.msra.mxu0 %v1761_v17 }
  0x4b   :  { %1458 = vmatprep.subr.bf16.mxu0 %v1609_v8 }
 0x110   :  { %v1311_v21 = vpop.f32.mrb[0].mxu0 }
 0x111   :  { %v161_v22 = vpop.f32.mrb[1].mxu0  ;;  %v167_v24 = vadd.f32 %v1311_v21, %v1232_v20 }
 0x112   :  { %v162_v23 = vadd.f32 %v1232_v20, %v161_v22 }
 0x114   :  { %1320 = vmatprep.mubr.msk.f32.mxu1 %vm181_vm1, %v162_v23 }
 0x115   :  { %1321 = vmatmul.mubr.msk.f32.vlgmr.msra.gmra.mrb[0].mxu1 %vm181_vm1, %v167_v24 }
 0x116   :  { %1442 = vmatpush3.bf16.msra.mxu1 %v1745_v11  ;;  %1342 = vmatprep.mubr.msk.f32.mxu1 %vm1610_vm2, %v1611_v19 }
 0x117   :  { %1443 = vmatprep.subr.bf16.mxu1 %v1609_v8 }
 0x118   :  { %v345_v25 = vpop.f32.mrb[2].mxu0 }
 0x119   :  { %v1333_v26 = vpop.f32.mrb[3].mxu0 }
 0x11a   :  { %1445 = vmatpush3.bf16.msra.mxu1 %v1761_v17 }
 0x11b   :  { %1452 = vmatprep.subr.bf16.mxu1 %v1609_v8 }
 0x1e8   :  { %v1322_v30 = vpop.f32.mrb[0].mxu1 }
 0x1e9   :  { %v1792_v31 = vadd.f32 %v1322_v30, %v1235_v29  ;;  %v254_v32 = vpop.f32.mrb[1].mxu1 }
 0x1ea   :  { %v1794_v33 = vadd.f32 %v1235_v29, %v254_v32 }
 0x1ec   :  { %v349_v36 = vadd.f32 %v345_v25, %v1794_v33 }
 0x1ee   :  { %v350_v37 = vmul.f32 %v349_v36, %v1796_v35 }
 0x1f0   :  { %1502 = vtanh.f32 %v350_v37 }
 0x1fa   :  { %v1503_v38 = vpop.eup %1502 }
 0x1fb   :  { %v352_v40 = vmul.f32 %v1503_v38, %v1796_v35 }
 0x1fd   :  { %v353_v41 = vadd.f32 %v352_v40, %v1800_v39 }
 0x1ff   :  { %360 = vrot.lane.b32.xlu0 %v353_v41, %s1613_s5 }
 0x203   :  { %355 = vrot.lane.b32.xlu0 %v275_v42, %s1614_s26 }
 0x271   :  { %v361_v43 = vpop.permute.xlu0 %360 }
 0x272   :  { %v363_v44 = vmul.f32 %v361_v43, %v353_v41 }
 0x274   :  { %365 = vrot.lane.b32.xlu1 %v363_v44, %s1614_s26 }
 0x275   :  { %v356_v45 = vpop.permute.xlu0 %355 }
 0x276   :  { %v358_v46 = vmul.f32 %v356_v45, %v353_v41 }
 0x2e6   :  { %v366_v47 = vpop.permute.xlu1 %365 }
 0x2e7   :  { %v368_v48 = vadd.f32 %v366_v47, %v358_v46 }
 0x2e9   :  { %1504 = vtanh.f32 %v368_v48  ;;  %v459_v63 = vrot.slane %v368_v48, 6 }
 0x2f3   :  { %v1505_v49 = vpop.eup %1504 }
 0x2f4   :  { %371 = vrot.lane.b32.xlu1 %v1505_v49, %s1613_s5 }
 0x366   :  { %v372_v50 = vpop.permute.xlu1 %371 }
 0x367   :  { %v1811_v51 = vmul.f32 %v372_v50, %v353_v41 }
 0x369   :  { %376 = vrot.lane.b32.xlu0 %v1811_v51, %s1614_s26 }
 0x3db   :  { %v377_v52 = vpop.permute.xlu0 %376 }
 0x3dc   :  { %1343 = vmatmul.mubr.msk.f32.vlgmr.msra.gmra.mrb[2].mxu1 %vm181_vm1, %v377_v52 }
 0x3dd   :  { %1454 = vmatpush3.bf16.msra.mxu1 %v1745_v11  ;;  %1364 = vmatprep.mubr.msk.f32.mxu1 %vm1610_vm2, %v1611_v19 }
 0x3de   :  { %1455 = vmatprep.subr.bf16.mxu1 %v1609_v8 }
 0x3e1   :  { %1457 = vmatpush3.bf16.msra.mxu1 %v1761_v17 }
 0x3e2   :  { %1464 = vmatprep.subr.bf16.mxu1 %v1609_v8 }
 0x4af   :  { %v446_v53 = vpop.f32.mrb[2].mxu1 }
 0x4b0   :  { %v451_v54 = vrot.slane %v446_v53, 6  ;;  %v1344_v55 = vpop.f32.mrb[3].mxu1 }
 0x4b2   :  { %v453_v56 = vadd.f32 %v451_v54, %v1794_v33 }
 0x4b4   :  { %v454_v57 = vmul.f32 %v453_v56, %v1796_v35 }
 0x4b6   :  { %1506 = vtanh.f32 %v454_v57 }
 0x4c0   :  { %v1507_v58 = vpop.eup %1506 }
 0x4c1   :  { %v456_v59 = vmul.f32 %v1507_v58, %v1796_v35 }
 0x4c3   :  { %v457_v60 = vadd.f32 %v456_v59, %v1800_v39 }
 0x4c5   :  { %463 = vrot.lane.b32.xlu1 %v457_v60, %s1613_s5  ;;  %v461_v0 = vmul.f32 %v459_v63, %v457_v60 }
 0x537   :  { %v464_v61 = vpop.permute.xlu1 %463 }
 0x538   :  { %v466_v62 = vmul.f32 %v464_v61, %v457_v60 }
 0x53a   :  { %468 = vrot.lane.b32.xlu0 %v466_v62, %s1614_s26 }
 0x5ac   :  { %v469_v1 = vpop.permute.xlu0 %468 }
 0x5ad   :  { %v471_v2 = vadd.f32 %v469_v1, %v461_v0 }
 0x5af   :  { %1508 = vtanh.f32 %v471_v2  ;;  %v563_v22 = vrot.slane %v471_v2, 6 }
 0x5b9   :  { %v1509_v3 = vpop.eup %1508 }
 0x5ba   :  { %474 = vrot.lane.b32.xlu1 %v1509_v3, %s1613_s5 }
 0x62c   :  { %v475_v4 = vpop.permute.xlu1 %474 }
 0x62d   :  { %v477_v5 = vmul.f32 %v475_v4, %v457_v60 }
 0x62f   :  { %v479_v6 = vrot.slane %v477_v5, 2  ;;  %v1110_v29 = vsel %vm1109_vm6, %v1811_v51, %v477_v5 }
 0x631   :  { %480 = vrot.lane.b32.xlu0 %v479_v6, %s1614_s26 }
 0x6a3   :  { %v481_v7 = vpop.permute.xlu0 %480 }
 0x6a4   :  { %1354 = vmatmul.mubr.msk.f32.vlgmr.msra.gmra.mrb[4].mxu0 %vm181_vm1, %v481_v7 }
 0x6a5   :  { %1460 = vmatpush3.bf16.msra.mxu0 %v1745_v11  ;;  %1375 = vmatprep.mubr.msk.f32.mxu0 %vm1610_vm2, %v1611_v19 }
 0x6a6   :  { %1461 = vmatprep.subr.bf16.mxu0 %v1609_v8 }
 0x6a9   :  { %1463 = vmatpush3.bf16.msra.mxu0 %v1761_v17 }
 0x6aa   :  { %1470 = vmatprep.subr.bf16.mxu0 %v1609_v8 }
 0x777   :  { %v550_v9 = vpop.f32.mrb[4].mxu0 }
 0x778   :  { %v555_v10 = vrot.slane %v550_v9, 4  ;;  %v1355_v12 = vpop.f32.mrb[5].mxu0 }
 0x77a   :  { %v557_v13 = vadd.f32 %v555_v10, %v1794_v33 }
 0x77c   :  { %v558_v14 = vmul.f32 %v557_v13, %v1796_v35 }
 0x77e   :  { %1510 = vtanh.f32 %v558_v14 }
 0x788   :  { %v1511_v15 = vpop.eup %1510 }
 0x789   :  { %v560_v16 = vmul.f32 %v1511_v15, %v1796_v35 }
 0x78b   :  { %v561_v18 = vadd.f32 %v560_v16, %v1800_v39 }
 0x78d   :  { %567 = vrot.lane.b32.xlu1 %v561_v18, %s1613_s5  ;;  %v565_v23 = vmul.f32 %v563_v22, %v561_v18 }
 0x7ff   :  { %v568_v20 = vpop.permute.xlu1 %567 }
 0x800   :  { %v570_v21 = vmul.f32 %v568_v20, %v561_v18 }
 0x802   :  { %572 = vrot.lane.b32.xlu0 %v570_v21, %s1614_s26 }
 0x874   :  { %v573_v24 = vpop.permute.xlu0 %572 }
 0x875   :  { %v575_v25 = vadd.f32 %v573_v24, %v565_v23 }
 0x877   :  { %1512 = vtanh.f32 %v575_v25  ;;  %v667_v47 = vrot.slane %v575_v25, 6 }
 0x881   :  { %v1513_v26 = vpop.eup %1512 }
 0x882   :  { %578 = vrot.lane.b32.xlu1 %v1513_v26, %s1613_s5 }
 0x8f4   :  { %v579_v27 = vpop.permute.xlu1 %578 }
 0x8f5   :  { %v581_v28 = vmul.f32 %v579_v27, %v561_v18 }
 0x8f7   :  { %v583_v30 = vrot.slane %v581_v28, 4  ;;  %v1112_v32 = vsel %vm1111_vm7, %v1110_v29, %v581_v28 }
 0x8f9   :  { %584 = vrot.lane.b32.xlu0 %v583_v30, %s1614_s26 }
 0x96b   :  { %v585_v34 = vpop.permute.xlu0 %584 }
 0x96c   :  { %1365 = vmatmul.mubr.msk.f32.vlgmr.msra.gmra.mrb[4].mxu1 %vm181_vm1, %v585_v34 }
 0x96d   :  { %1466 = vmatpush3.bf16.msra.mxu1 %v1745_v11  ;;  %1386 = vmatprep.mubr.msk.f32.mxu1 %vm1610_vm2, %v1611_v19 }
 0x96e   :  { %1467 = vmatprep.subr.bf16.mxu1 %v1609_v8 }
 0x971   :  { %1469 = vmatpush3.bf16.msra.mxu1 %v1761_v17 }
 0x972   :  { %1476 = vmatprep.subr.bf16.mxu1 %v1609_v8 }
 0xa3f   :  { %v654_v36 = vpop.f32.mrb[4].mxu1 }
 0xa40   :  { %v659_v37 = vrot.slane %v654_v36, 2  ;;  %v1366_v38 = vpop.f32.mrb[5].mxu1 }
 0xa42   :  { %v661_v40 = vadd.f32 %v659_v37, %v1794_v33 }
 0xa44   :  { %v662_v41 = vmul.f32 %v661_v40, %v1796_v35 }
 0xa46   :  { %1514 = vtanh.f32 %v662_v41 }
 0xa50   :  { %v1515_v42 = vpop.eup %1514 }
 0xa51   :  { %v664_v43 = vmul.f32 %v1515_v42, %v1796_v35 }
 0xa53   :  { %v665_v44 = vadd.f32 %v664_v43, %v1800_v39 }
 0xa55   :  { %671 = vrot.lane.b32.xlu1 %v665_v44, %s1613_s5  ;;  %v669_v48 = vmul.f32 %v667_v47, %v665_v44 }
 0xac7   :  { %v672_v45 = vpop.permute.xlu1 %671 }
 0xac8   :  { %v674_v46 = vmul.f32 %v672_v45, %v665_v44 }
 0xaca   :  { %676 = vrot.lane.b32.xlu0 %v674_v46, %s1614_s26 }
 0xb3c   :  { %v677_v49 = vpop.permute.xlu0 %676 }
 0xb3d   :  { %v679_v50 = vadd.f32 %v677_v49, %v669_v48 }
 0xb3f   :  { %1516 = vtanh.f32 %v679_v50  ;;  %v768_v1 = vrot.slane %v679_v50, 6 }
 0xb49   :  { %v1517_v33 = vpop.eup %1516 }
 0xb4a   :  { %682 = vrot.lane.b32.xlu1 %v1517_v33, %s1613_s5 }
 0xbbc   :  { %v683_v51 = vpop.permute.xlu1 %682 }
 0xbbd   :  { %v685_v52 = vmul.f32 %v683_v51, %v665_v44 }
 0xbbf   :  { %v687_v53 = vrot.slane %v685_v52, 6  ;;  %v1863_v54 = vsel %vm1113_vm8, %v1112_v32, %v685_v52 }
 0xbc1   :  { %688 = vrot.lane.b32.xlu0 %v687_v53, %s1614_s26 }
 0xc33   :  { %v689_v55 = vpop.permute.xlu0 %688 }
 0xc34   :  { %1376 = vmatmul.mubr.msk.f32.vlgmr.msra.gmra.mrb[6].mxu0 %vm181_vm1, %v689_v55 }
 0xc35   :  { %1472 = vmatpush3.bf16.msra.mxu0 %v1745_v11  ;;  %1397 = vmatprep.mubr.msk.f32.mxu0 %vm1610_vm2, %v1611_v19 }
 0xc36   :  { %1473 = vmatprep.subr.bf16.mxu0 %v1609_v8 }
 0xc39   :  { %1475 = vmatpush3.bf16.msra.mxu0 %v1761_v17 }
 0xd07   :  { %v758_v56 = vpop.f32.mrb[6].mxu0 }
 0xd08   :  { %v762_v57 = vadd.f32 %v758_v56, %v1792_v31  ;;  %v1377_v58 = vpop.f32.mrb[7].mxu0 }
 0xd0a   :  { %v763_v59 = vmul.f32 %v762_v57, %v1796_v35 }
 0xd0c   :  { %1518 = vtanh.f32 %v763_v59 }
 0xd16   :  { %v1519_v60 = vpop.eup %1518 }
 0xd17   :  { %v765_v61 = vmul.f32 %v1519_v60, %v1796_v35 }
 0xd19   :  { %v766_v62 = vadd.f32 %v765_v61, %v1800_v39 }
 0xd1b   :  { %772 = vrot.lane.b32.xlu1 %v766_v62, %s1613_s5  ;;  %v770_v2 = vmul.f32 %v768_v1, %v766_v62 }
 0xd8d   :  { %v773_v63 = vpop.permute.xlu1 %772 }
 0xd8e   :  { %v775_v0 = vmul.f32 %v773_v63, %v766_v62  ;;  %v1118_v63 = vmax.f32 %v1863_v54, 0.0 }
 0xd90   :  { %777 = vrot.lane.b32.xlu0 %v775_v0, %s1614_s26 }
 0xe02   :  { %v778_v3 = vpop.permute.xlu0 %777 }
 0xe03   :  { %v780_v4 = vadd.f32 %v778_v3, %v770_v2 }
 0xe05   :  { %1520 = vtanh.f32 %v780_v4 }
 0xe0f   :  { %v1521_v5 = vpop.eup %1520 }
 0xe10   :  { %783 = vrot.lane.b32.xlu1 %v1521_v5, %s1613_s5 }
 0xe82   :  { %v784_v6 = vpop.permute.xlu1 %783 }
 0xe83   :  { %v786_v7 = vmul.f32 %v784_v6, %v766_v62  ;;  %v1123_v6 = vld [vmem:[#allocation4 + $0x18] sm:$0xff] }
 0xe85   :  { %788 = vrot.lane.b32.xlu0 %v786_v7, %s1614_s26 }
 0xef7   :  { %v789_v9 = vpop.permute.xlu0 %788 }
 0xef8   :  { %1387 = vmatmul.mubr.msk.f32.vlgmr.msra.gmra.mrb[6].mxu1 %vm181_vm1, %v789_v9 }
 0xef9   :  { %1478 = vmatpush3.bf16.msra.mxu1 %v1745_v11  ;;  %1408 = vmatprep.mubr.msk.f32.mxu1 %vm1610_vm2, %v1611_v19 }
 0xefa   :  { %1479 = vmatprep.subr.bf16.mxu1 %v1609_v8  ;;  %v871_v8 = vrot.slane %v780_v4, 6  ;;  %v1122_v4 = vld [vmem:[#allocation4 + $0x10] sm:$0xff] }
 0xefd   :  { %1481 = vmatpush3.bf16.msra.mxu1 %v1761_v17 }
 0xfcb   :  { %v858_v10 = vpop.f32.mrb[6].mxu1 }
 0xfcc   :  { %v863_v12 = vrot.slane %v858_v10, 6  ;;  %v1388_v13 = vpop.f32.mrb[7].mxu1 }
 0xfce   :  { %v865_v14 = vadd.f32 %v863_v12, %v1792_v31 }
 0xfd0   :  { %v866_v15 = vmul.f32 %v865_v14, %v1796_v35 }
 0xfd2   :  { %1522 = vtanh.f32 %v866_v15 }
 0xfdc   :  { %v1523_v16 = vpop.eup %1522 }
 0xfdd   :  { %v868_v18 = vmul.f32 %v1523_v16, %v1796_v35 }
 0xfdf   :  { %v869_v11 = vadd.f32 %v868_v18, %v1800_v39  ;;  %v1246_v18 = vld [vmem:[#allocation6] ss:$0 sm:$0xff] }
 0xfe1   :  { %875 = vrot.lane.b32.xlu1 %v869_v11, %s1613_s5  ;;  %v873_v17 = vmul.f32 %v871_v8, %v869_v11 }
0x1053   :  { %v876_v19 = vpop.permute.xlu1 %875 }
0x1054   :  { %v878_v20 = vmul.f32 %v876_v19, %v869_v11 }
0x1056   :  { %880 = vrot.lane.b32.xlu0 %v878_v20, %s1614_s26 }
0x10c8   :  { %v881_v21 = vpop.permute.xlu0 %880 }
0x10c9   :  { %v883_v22 = vadd.f32 %v881_v21, %v873_v17 }
0x10cb   :  { %1524 = vtanh.f32 %v883_v22  ;;  %v975_v42 = vrot.slane %v883_v22, 6 }
0x10d5   :  { %v1525_v23 = vpop.eup %1524 }
0x10d6   :  { %886 = vrot.lane.b32.xlu1 %v1525_v23, %s1613_s5 }
0x1148   :  { %v887_v24 = vpop.permute.xlu1 %886 }
0x1149   :  { %v889_v25 = vmul.f32 %v887_v24, %v869_v11 }
0x114b   :  { %v891_v26 = vrot.slane %v889_v25, 2  ;;  %v1115_v49 = vsel %vm1109_vm6, %v786_v7, %v889_v25  ;;  %v1486_v7 = vpack.c.bf16 %v1123_v6, %v1122_v4 }
0x114d   :  { %892 = vrot.lane.b32.xlu0 %v891_v26, %s1614_s26 }
0x11bf   :  { %v893_v27 = vpop.permute.xlu0 %892 }
0x11c0   :  { %1398 = vmatmul.mubr.msk.f32.vlgmr.msra.gmra.mrb[8].mxu0 %vm181_vm1, %v893_v27 }
0x1293   :  { %v962_v28 = vpop.f32.mrb[8].mxu0 }
0x1294   :  { %v967_v29 = vrot.slane %v962_v28, 4  ;;  %v1399_v30 = vpop.f32.mrb[9].mxu0 }
0x1296   :  { %v969_v32 = vadd.f32 %v967_v29, %v1792_v31 }
0x1298   :  { %v970_v34 = vmul.f32 %v969_v32, %v1796_v35 }
0x129a   :  { %1526 = vtanh.f32 %v970_v34 }
0x12a4   :  { %v1527_v36 = vpop.eup %1526 }
0x12a5   :  { %v972_v37 = vmul.f32 %v1527_v36, %v1796_v35 }
0x12a7   :  { %v973_v38 = vadd.f32 %v972_v37, %v1800_v39 }
0x12a9   :  { %979 = vrot.lane.b32.xlu1 %v973_v38, %s1613_s5  ;;  %v977_v43 = vmul.f32 %v975_v42, %v973_v38 }
0x131b   :  { %v980_v40 = vpop.permute.xlu1 %979 }
0x131c   :  { %v982_v41 = vmul.f32 %v980_v40, %v973_v38 }
0x131e   :  { %984 = vrot.lane.b32.xlu0 %v982_v41, %s1614_s26 }
0x1390   :  { %v985_v44 = vpop.permute.xlu0 %984 }
0x1391   :  { %v987_v45 = vadd.f32 %v985_v44, %v977_v43 }
0x1393   :  { %1528 = vtanh.f32 %v987_v45  ;;  %v1079_v0 = vrot.slane %v987_v45, 6 }
0x139d   :  { %v1529_v46 = vpop.eup %1528 }
0x139e   :  { %990 = vrot.lane.b32.xlu1 %v1529_v46, %s1613_s5 }
0x1410   :  { %v991_v47 = vpop.permute.xlu1 %990 }
0x1411   :  { %v993_v48 = vmul.f32 %v991_v47, %v973_v38 }
0x1413   :  { %v995_v50 = vrot.slane %v993_v48, 4  ;;  %v1116_v33 = vsel %vm1111_vm7, %v1115_v49, %v993_v48 }
0x1415   :  { %996 = vrot.lane.b32.xlu0 %v995_v50, %s1614_s26 }
0x1487   :  { %v997_v51 = vpop.permute.xlu0 %996 }
0x1488   :  { %1409 = vmatmul.mubr.msk.f32.vlgmr.msra.gmra.mrb[8].mxu1 %vm181_vm1, %v997_v51 }
0x155b   :  { %v1066_v52 = vpop.f32.mrb[8].mxu1 }
0x155c   :  { %v1071_v53 = vrot.slane %v1066_v52, 2  ;;  %v1410_v55 = vpop.f32.mrb[9].mxu1 }
0x155e   :  { %v1073_v56 = vadd.f32 %v1071_v53, %v1792_v31 }
0x1560   :  { %v1074_v57 = vmul.f32 %v1073_v56, %v1796_v35 }
0x1562   :  { %1530 = vtanh.f32 %v1074_v57 }
0x156c   :  { %v1531_v58 = vpop.eup %1530 }
0x156d   :  { %v1076_v59 = vmul.f32 %v1531_v58, %v1796_v35  ;;  %v1120_v35 = vld [vmem:[#allocation4] sm:$0xff] }
0x156f   :  { %v1077_v60 = vadd.f32 %v1076_v59, %v1800_v39  ;;  %v1121_v39 = vld [vmem:[#allocation4 + $0x8] sm:$0xff] }
0x1570   :  { %v1482_v5 = vpack.c.bf16 %v1121_v39, %v1120_v35 }
0x1571   :  { %1083 = vrot.lane.b32.xlu1 %v1077_v60, %s1613_s5  ;;  %v1081_v31 = vmul.f32 %v1079_v0, %v1077_v60 }
0x1572   :  { %1483 = vmatprep.subr.bf16.mxu0 %v1482_v5 }
0x1573   :  { %1485 = vmatpush3.bf16.msra.mxu0 %v1482_v5 }
0x1574   :  { %1487 = vmatprep.subr.bf16.mxu0 %v1486_v7 }
0x1577   :  { %1489 = vmatpush3.bf16.msra.mxu0 %v1486_v7 }
0x15e3   :  { %v1084_v61 = vpop.permute.xlu1 %1083 }
0x15e4   :  { %v1086_v62 = vmul.f32 %v1084_v61, %v1077_v60 }
0x15e6   :  { %1088 = vrot.lane.b32.xlu0 %v1086_v62, %s1614_s26 }
0x15ea   :  { %1133 = vrot.lane.b32.xlu0 %v1118_v63, %s1614_s26 }
0x1658   :  { %v1089_v1 = vpop.permute.xlu0 %1088 }
0x1659   :  { %v1091_v2 = vadd.f32 %v1089_v1, %v1081_v31 }
0x165b   :  { %1532 = vtanh.f32 %v1091_v2 }
0x165c   :  { %v1134_v3 = vpop.permute.xlu0 %1133 }
0x165d   :  { %1419 = vmatprep.mubr.msk.f32.mxu0 %vm181_vm1, %v1134_v3 }
0x1665   :  { %v1533_v9 = vpop.eup %1532 }
0x1666   :  { %1094 = vrot.lane.b32.xlu1 %v1533_v9, %s1613_s5 }
0x16d8   :  { %v1095_v54 = vpop.permute.xlu1 %1094 }
0x16d9   :  { %v1097_v10 = vmul.f32 %v1095_v54, %v1077_v60 }
0x16db   :  { %1099 = vrot.lane.b32.xlu0 %v1097_v10, %s1614_s26  ;;  %v1117_v12 = vsel %vm1113_vm8, %v1116_v33, %v1097_v10 }
0x16dc   :  { %v1119_v13 = vmax.f32 %v1117_v12, 0.0 }
0x16de   :  { %1135 = vrot.lane.b32.xlu1 %v1119_v13, %s1614_s26 }
0x16e2   :  { %1105 = vrot.lane.b32.xlu1 %v1091_v2, %s1615_s9 }
0x174d   :  { %v1100_v14 = vpop.permute.xlu0 %1099 }
0x174e   :  { %1103 = vst.msk [vmem:[%s1943_s11 - $0x6] sm:$0xc0] %vm1102_vm9, %v1100_v14 }
0x1750   :  { %v1136_v15 = vpop.permute.xlu1 %1135 }
0x1751   :  { %1420 = vmatmul.mubr.msk.f32.vlgmr.msra.gmra.mrb[10].mxu0 %vm181_vm1, %v1136_v15 }
0x1754   :  { %v1106_v16 = vpop.permute.xlu1 %1105 }
0x1755   :  { %1108 = vst.msk [vmem:[%s1944_s12 - $0x6] sm:$0xc0] %vm1102_vm9, %v1106_v16 }
0x1824   :  { %v1421_v11 = vpop.f32.mrb[10].mxu0 }
0x1825   :  { %v1213_v19 = vadd.f32 %v1421_v11, %v1246_v18  ;;  %v1207_v20 = vpop.f32.mrb[11].mxu0 }
0x1826   :  { %v1208_v8 = vadd.f32 %v1246_v18, %v1207_v20 }
0x1827   :  { %1217 = vst [vmem:[%s1942_s10 + $0x8] sm:$0xff] %v1213_v19 }
0x1828   :  { %1216 = vst [vmem:[%s1942_s10] sm:$0xff] %v1208_v8 }
0x1829   :  { %1230 = vsyncpa [#allocation3], 1 }
0x182a   :  { %1231 = vsyncpa [#allocation5], 1 }

</bundles_post_ra>
